<compile_context>
chip_gen: v6e
topology: v6e:2x2x1
jax: 0.10.0
libtpu: 0.0.40
codegen_flags: <defaults>
</compile_context>

<pallas_src>
import math

import jax
import jax.numpy as jnp
from jax import lax
from jax.experimental import pallas as pl
from jax.experimental.pallas import tpu as pltpu

BN_EPS = 1e-5  # PyTorch BatchNorm2d default


def _make_fused_kernel(N, C, H, W):
    NWc = N * W * C  # lane width of every row (128 for the test config)

    def kernel(xf_ref, wb_ref, o_ref):
        # xf_ref: [H+2, N*W*C]   row-flattened input, batch on lanes,
        #                        rows 0 and H+1 are zero vertical halo
        # wb_ref: [3, N*W*C, N*W*C]  block-diagonal banded weights (1 / v-tap)
        # o_ref:  [H, N*W*C]     output in the same lane layout (128 dense)

        # ---- conv: three banded MXU matmuls, one per vertical tap ---------
        conv = jnp.dot(xf_ref[0:H, :], wb_ref[0],
                       preferred_element_type=jnp.float32)
        conv = conv + jnp.dot(xf_ref[1:H + 1, :], wb_ref[1],
                              preferred_element_type=jnp.float32)
        conv = conv + jnp.dot(xf_ref[2:H + 2, :], wb_ref[2],
                              preferred_element_type=jnp.float32)  # [H, NWc]

        # ---- BatchNorm (training-mode batch stats, gamma=1, beta=0) -------
        # Lanes are (n, w, c) with c minor, so channel c owns every lane l
        # with l % C == c.  Fold/broadcast across lanes with a tiny MXU
        # matmul against the channel-pattern matrix P (no lane<->sublane
        # reshapes, no host round trip).
        li = lax.broadcasted_iota(jnp.int32, (NWc, NWc), 0)
        lj = lax.broadcasted_iota(jnp.int32, (NWc, NWc), 1)
        P = (li % C == lj % C).astype(jnp.float32)                 # [NWc, NWc]
        inv_m = 1.0 / float(N * H * W)

        mean = jnp.dot(jnp.sum(conv, axis=0, keepdims=True), P,
                       preferred_element_type=jnp.float32) * inv_m  # [1, NWc]
        d = conv - mean                                             # centered
        var = jnp.dot(jnp.sum(d * d, axis=0, keepdims=True), P,
                      preferred_element_type=jnp.float32) * inv_m   # [1, NWc]
        scale = lax.rsqrt(var + BN_EPS)

        # ---- ReLU + residual (interior rows of the same input) ------------
        res = xf_ref[1:H + 1, :].astype(jnp.float32)                # [H, NWc]
        out = jnp.maximum(d * scale, 0.0) + res
        o_ref[...] = out.astype(o_ref.dtype)        # 128-lane dense store

    return kernel


def _build_banded_weights(w_hwio, N, C, W):
    """wb[dy, A, B] with A = n*W*C + u*C + ci, B = n*W*C + w*C + co,
    equal to w[dy, dx, ci, co] when u = w + dx - 1 is in range (same image),
    zero otherwise (this folds the horizontal 'same' padding into the band).
    Built once at trace time on tiny arrays."""
    WC = W * C
    w32 = w_hwio.astype(jnp.float32)
    a = jnp.arange(WC)[:, None]                 # input-row lane index (1 img)
    b = jnp.arange(WC)[None, :]                 # output-row lane index
    dx = a // C - b // C + 1                    # horizontal tap, valid in [0,3)
    band = w32[:, jnp.clip(dx, 0, 2), a % C, b % C]          # [3, WC, WC]
    band = jnp.where(((dx >= 0) & (dx < 3))[None], band, 0.0)
    wb = jnp.zeros((3, N * WC, N * WC), jnp.float32)
    for n in range(N):                          # block-diagonal over images
        wb = wb.at[:, n * WC:(n + 1) * WC, n * WC:(n + 1) * WC].set(band)
    return wb


@jax.jit
def resblock_forward(x_nchw, w_hwio, bias=None):
    """x_nchw: [N, C, H, W]; w_hwio: [3, 3, C_in, C_out]; bias: [C_out]."""
    N, C, H, W = x_nchw.shape
    NWc = N * W * C
    # Per-channel conv bias is exactly cancelled by the mean-subtracting
    # BatchNorm (gamma=1, beta=0): never load it.
    del bias

    # ---- layout: NCHW -> row-flattened [H, (n, w, c)] + 2 zero halo rows ---
    # TODO(synk): for large activations this relayout (and the output
    # transpose) should move into the kernel (halo row tiles + in-kernel lane
    # flattening); at 8 KiB it is a single fused XLA pass under jit.
    xf = jnp.transpose(x_nchw, (2, 0, 3, 1)).reshape(H, NWc)   # [H, N*W*C]
    xf = jnp.pad(xf.astype(jnp.float32), ((1, 1), (0, 0)))     # [H+2, N*W*C]

    wb = _build_banded_weights(w_hwio, N, C, W)                # [3, NWc, NWc]

    kernel = _make_fused_kernel(N, C, H, W)
    out_flat = pl.pallas_call(
        kernel,
        out_shape=jax.ShapeDtypeStruct((H, NWc), x_nchw.dtype),
        grid=(1,),  # single fused step: conv + stats + BN + ReLU + residual
        in_specs=[
            pl.BlockSpec((H + 2, NWc), lambda i: (0, 0)),
            pl.BlockSpec((3, NWc, NWc), lambda i: (0, 0, 0)),
        ],
        out_specs=pl.BlockSpec((H, NWc), lambda i: (0, 0)),
        compiler_params=pltpu.CompilerParams(
            # One step, everything resident: nothing to shard.  For large N,
            # tile the batch on a grid axis and use CORE_PARALLEL on v7x.
            dimension_semantics=("arbitrary",),
            vmem_limit_bytes=32 * 1024 * 1024),
    )(xf, wb)

    # [H, (n, w, c)] -> [N, C, H, W]
    out = out_flat.reshape(H, N, W, C)
    return jnp.transpose(out, (1, 3, 0, 2))


def resblock_reference(x_nchw, w_hwio, bias):
    """Pure-JAX reference matching PyTorch ResBlock.forward (training mode)."""
    conv = lax.conv_general_dilated(
        x_nchw.astype(jnp.float32),
        w_hwio.astype(jnp.float32),
        window_strides=(1, 1),
        padding=((1, 1), (1, 1)),
        dimension_numbers=("NCHW", "HWIO", "NCHW"),
    ) + bias.reshape(1, -1, 1, 1)
    mean = jnp.mean(conv, axis=(0, 2, 3), keepdims=True)
    var = jnp.mean((conv - mean) ** 2, axis=(0, 2, 3), keepdims=True)
    out = jnp.maximum((conv - mean) * lax.rsqrt(var + BN_EPS), 0.0)
    return out + x_nchw


if __name__ == "__main__":
    key = jax.random.PRNGKey(0)
    k_x, k_w, k_b = jax.random.split(key, 3)

    N, C, H, W = 2, 4, 16, 16
    x = jax.random.normal(k_x, (N, C, H, W), dtype=jnp.float32)

    # Conv2d(C, C, kernel_size=3, padding=1), kaiming_normal_ (relu):
    # std = sqrt(2 / fan_in), fan_in = C * 3 * 3.
    fan_in = C * 3 * 3
    w_hwio = jax.random.normal(k_w, (3, 3, C, C), dtype=jnp.float32) * math.sqrt(2.0 / fan_in)
    # Conv bias: PyTorch default uniform(-1/sqrt(fan_in), 1/sqrt(fan_in)).
    bound = 1.0 / math.sqrt(fan_in)
    bias = jax.random.uniform(k_b, (C,), dtype=jnp.float32, minval=-bound, maxval=bound)

    out = jax.block_until_ready(resblock_forward(x, w_hwio, bias))
    ref = jax.block_until_ready(resblock_reference(x, w_hwio, bias))

    assert out.shape == (N, C, H, W)
    assert jnp.allclose(out, ref, atol=1e-4, rtol=1e-4), "mismatch vs reference"
    print("KERNEL_OK")
</pallas_src>

<mosaic_0001>
module attributes {stable_mosaic.version = 11 : i64} {
  func.func @kernel(%arg0: i32, %arg1: memref<18x128xf32, #tpu.memory_space<vmem>>, %arg2: memref<3x128x128xf32, #tpu.memory_space<vmem>>, %arg3: memref<16x128xf32, #tpu.memory_space<vmem>>) attributes {dimension_semantics = [#tpu.dimension_semantics<arbitrary>], iteration_bounds = array<i64: 1>, scalar_prefetch = 0 : i64, scratch_operands = 0 : i64, tpu.core_type = #tpu.core_type<tc>, window_params = [{pipeline_mode = #tpu.pipeline_mode<synchronous>, transform_indices = @transform_0, window_bounds = array<i64: 18, 128>}, {pipeline_mode = #tpu.pipeline_mode<synchronous>, transform_indices = @transform_1, window_bounds = array<i64: 3, 128, 128>}, {pipeline_mode = #tpu.pipeline_mode<synchronous>, transform_indices = @transform_2, window_bounds = array<i64: 16, 128>}]} {
    %c0 = arith.constant 0 : index
    %c0_0 = arith.constant 0 : index
    %0 = vector.load %arg1[%c0, %c0_0] : memref<18x128xf32, #tpu.memory_space<vmem>>, vector<16x128xf32>
    %c0_1 = arith.constant 0 : index
    %c0_2 = arith.constant 0 : index
    %c0_3 = arith.constant 0 : index
    %1 = vector.load %arg2[%c0_1, %c0_2, %c0_3] : memref<3x128x128xf32, #tpu.memory_space<vmem>>, vector<1x128x128xf32>
    %2 = vector.shape_cast %1 : vector<1x128x128xf32> to vector<128x128xf32>
    %cst = arith.constant dense<0.000000e+00> : vector<16x128xf32>
    %3 = tpu.matmul %0, %2, %cst {dimension_numbers = #tpu.dot_dimension_numbers<[1], [0], [0], [1], [0, 0, 1, 1], [], []>} : vector<16x128xf32>, vector<128x128xf32>, vector<16x128xf32> -> vector<16x128xf32>
    %c1 = arith.constant 1 : index
    %c0_4 = arith.constant 0 : index
    %4 = vector.load %arg1[%c1, %c0_4] : memref<18x128xf32, #tpu.memory_space<vmem>>, vector<16x128xf32>
    %c1_5 = arith.constant 1 : index
    %c0_6 = arith.constant 0 : index
    %c0_7 = arith.constant 0 : index
    %5 = vector.load %arg2[%c1_5, %c0_6, %c0_7] : memref<3x128x128xf32, #tpu.memory_space<vmem>>, vector<1x128x128xf32>
    %6 = vector.shape_cast %5 : vector<1x128x128xf32> to vector<128x128xf32>
    %cst_8 = arith.constant dense<0.000000e+00> : vector<16x128xf32>
    %7 = tpu.matmul %4, %6, %cst_8 {dimension_numbers = #tpu.dot_dimension_numbers<[1], [0], [0], [1], [0, 0, 1, 1], [], []>} : vector<16x128xf32>, vector<128x128xf32>, vector<16x128xf32> -> vector<16x128xf32>
    %8 = arith.addf %3, %7 : vector<16x128xf32>
    %c2 = arith.constant 2 : index
    %c0_9 = arith.constant 0 : index
    %9 = vector.load %arg1[%c2, %c0_9] : memref<18x128xf32, #tpu.memory_space<vmem>>, vector<16x128xf32>
    %c2_10 = arith.constant 2 : index
    %c0_11 = arith.constant 0 : index
    %c0_12 = arith.constant 0 : index
    %10 = vector.load %arg2[%c2_10, %c0_11, %c0_12] : memref<3x128x128xf32, #tpu.memory_space<vmem>>, vector<1x128x128xf32>
    %11 = vector.shape_cast %10 : vector<1x128x128xf32> to vector<128x128xf32>
    %cst_13 = arith.constant dense<0.000000e+00> : vector<16x128xf32>
    %12 = tpu.matmul %9, %11, %cst_13 {dimension_numbers = #tpu.dot_dimension_numbers<[1], [0], [0], [1], [0, 0, 1, 1], [], []>} : vector<16x128xf32>, vector<128x128xf32>, vector<16x128xf32> -> vector<16x128xf32>
    %13 = arith.addf %8, %12 : vector<16x128xf32>
    %14 = tpu.iota {dimensions = array<i32: 0>} : vector<128x128xi32>
    %15 = tpu.iota {dimensions = array<i32: 1>} : vector<128x128xi32>
    %c4_i32 = arith.constant 4 : i32
    %c0_i32 = arith.constant 0 : i32
    %16 = arith.cmpi eq, %c4_i32, %c0_i32 : i32
    %c1_i32 = arith.constant 1 : i32
    %17 = arith.select %16, %c1_i32, %c4_i32 : i32
    %18 = vector.broadcast %17 : i32 to vector<128x128xi32>
    %19 = arith.remsi %14, %18 : vector<128x128xi32>
    %c0_i32_14 = arith.constant 0 : i32
    %20 = vector.broadcast %c0_i32_14 : i32 to vector<128x128xi32>
    %21 = arith.cmpi ne, %19, %20 : vector<128x128xi32>
    %c0_i32_15 = arith.constant 0 : i32
    %22 = vector.broadcast %c0_i32_15 : i32 to vector<128x128xi32>
    %23 = arith.cmpi slt, %19, %22 : vector<128x128xi32>
    %c0_i32_16 = arith.constant 0 : i32
    %24 = arith.cmpi slt, %17, %c0_i32_16 : i32
    %25 = vector.broadcast %24 : i1 to vector<128x128xi1>
    %26 = vector.broadcast %25 : vector<128x128xi1> to vector<128x128xi1>
    %27 = arith.xori %23, %26 : vector<128x128xi1>
    %28 = arith.andi %27, %21 : vector<128x128xi1>
    %29 = vector.broadcast %17 : i32 to vector<128x128xi32>
    %30 = arith.addi %19, %29 : vector<128x128xi32>
    %31 = arith.select %28, %30, %19 : vector<128x128xi1>, vector<128x128xi32>
    %c4_i32_17 = arith.constant 4 : i32
    %c0_i32_18 = arith.constant 0 : i32
    %32 = arith.cmpi eq, %c4_i32_17, %c0_i32_18 : i32
    %c1_i32_19 = arith.constant 1 : i32
    %33 = arith.select %32, %c1_i32_19, %c4_i32_17 : i32
    %34 = vector.broadcast %33 : i32 to vector<128x128xi32>
    %35 = arith.remsi %15, %34 : vector<128x128xi32>
    %c0_i32_20 = arith.constant 0 : i32
    %36 = vector.broadcast %c0_i32_20 : i32 to vector<128x128xi32>
    %37 = arith.cmpi ne, %35, %36 : vector<128x128xi32>
    %c0_i32_21 = arith.constant 0 : i32
    %38 = vector.broadcast %c0_i32_21 : i32 to vector<128x128xi32>
    %39 = arith.cmpi slt, %35, %38 : vector<128x128xi32>
    %c0_i32_22 = arith.constant 0 : i32
    %40 = arith.cmpi slt, %33, %c0_i32_22 : i32
    %41 = vector.broadcast %40 : i1 to vector<128x128xi1>
    %42 = vector.broadcast %41 : vector<128x128xi1> to vector<128x128xi1>
    %43 = arith.xori %39, %42 : vector<128x128xi1>
    %44 = arith.andi %43, %37 : vector<128x128xi1>
    %45 = vector.broadcast %33 : i32 to vector<128x128xi32>
    %46 = arith.addi %35, %45 : vector<128x128xi32>
    %47 = arith.select %44, %46, %35 : vector<128x128xi1>, vector<128x128xi32>
    %48 = arith.cmpi eq, %31, %47 : vector<128x128xi32>
    %49 = arith.extui %48 : vector<128x128xi1> to vector<128x128xi32>
    %50 = arith.sitofp %49 : vector<128x128xi32> to vector<128x128xf32>
    %cst_23 = arith.constant dense<0.000000e+00> : vector<128xf32>
    %51 = vector.multi_reduction <add>, %13, %cst_23 [0] : vector<16x128xf32> to vector<128xf32>
    %52 = vector.shape_cast %51 : vector<128xf32> to vector<1x128xf32>
    %cst_24 = arith.constant dense<0.000000e+00> : vector<1x128xf32>
    %53 = tpu.matmul %52, %50, %cst_24 {dimension_numbers = #tpu.dot_dimension_numbers<[1], [0], [0], [1], [0, 0, 1, 1], [], []>} : vector<1x128xf32>, vector<128x128xf32>, vector<1x128xf32> -> vector<1x128xf32>
    %cst_25 = arith.constant 0.001953125 : f32
    %54 = vector.broadcast %cst_25 : f32 to vector<1x128xf32>
    %55 = arith.mulf %53, %54 : vector<1x128xf32>
    %56 = vector.broadcast %55 : vector<1x128xf32> to vector<16x128xf32>
    %57 = arith.subf %13, %56 : vector<16x128xf32>
    %58 = arith.mulf %57, %57 : vector<16x128xf32>
    %cst_26 = arith.constant dense<0.000000e+00> : vector<128xf32>
    %59 = vector.multi_reduction <add>, %58, %cst_26 [0] : vector<16x128xf32> to vector<128xf32>
    %60 = vector.shape_cast %59 : vector<128xf32> to vector<1x128xf32>
    %cst_27 = arith.constant dense<0.000000e+00> : vector<1x128xf32>
    %61 = tpu.matmul %60, %50, %cst_27 {dimension_numbers = #tpu.dot_dimension_numbers<[1], [0], [0], [1], [0, 0, 1, 1], [], []>} : vector<1x128xf32>, vector<128x128xf32>, vector<1x128xf32> -> vector<1x128xf32>
    %cst_28 = arith.constant 0.001953125 : f32
    %62 = vector.broadcast %cst_28 : f32 to vector<1x128xf32>
    %63 = arith.mulf %61, %62 : vector<1x128xf32>
    %cst_29 = arith.constant 9.99999974E-6 : f32
    %64 = vector.broadcast %cst_29 : f32 to vector<1x128xf32>
    %65 = arith.addf %63, %64 : vector<1x128xf32>
    %66 = math.rsqrt %65 : vector<1x128xf32>
    %c1_30 = arith.constant 1 : index
    %c0_31 = arith.constant 0 : index
    %67 = vector.load %arg1[%c1_30, %c0_31] : memref<18x128xf32, #tpu.memory_space<vmem>>, vector<16x128xf32>
    %68 = vector.broadcast %66 : vector<1x128xf32> to vector<16x128xf32>
    %69 = arith.mulf %57, %68 : vector<16x128xf32>
    %cst_32 = arith.constant 0.000000e+00 : f32
    %70 = vector.broadcast %cst_32 : f32 to vector<16x128xf32>
    %71 = arith.maximumf %69, %70 : vector<16x128xf32>
    %72 = arith.addf %71, %67 : vector<16x128xf32>
    %c0_33 = arith.constant 0 : index
    %c0_34 = arith.constant 0 : index
    %73 = vector.load %arg3[%c0_33, %c0_34] : memref<16x128xf32, #tpu.memory_space<vmem>>, vector<16x128xf32>
    tpu.vector_store %arg3[%c0_33, %c0_34], %72 {strides = array<i32>} : memref<16x128xf32, #tpu.memory_space<vmem>>, vector<16x128xf32>,
    return
  }
  func.func @transform_0(%arg0: i32) -> (i32, i32) {
    %c0_i32 = arith.constant 0 : i32
    %c0_i32_0 = arith.constant 0 : i32
    %c0_i32_1 = arith.constant 0 : i32
    return %c0_i32, %c0_i32_0 : i32, i32
  }
  func.func @transform_1(%arg0: i32) -> (i32, i32, i32) {
    %c0_i32 = arith.constant 0 : i32
    %c0_i32_0 = arith.constant 0 : i32
    %c0_i32_1 = arith.constant 0 : i32
    %c0_i32_2 = arith.constant 0 : i32
    return %c0_i32, %c0_i32_0, %c0_i32_1 : i32, i32, i32
  }
  func.func @transform_2(%arg0: i32) -> (i32, i32) {
    %c0_i32 = arith.constant 0 : i32
    %c0_i32_0 = arith.constant 0 : i32
    %c0_i32_1 = arith.constant 0 : i32
    return %c0_i32, %c0_i32_0 : i32, i32
  }
}

</mosaic_0001>

<bundles_post_ra>
// kernel: resblock_forward.1
= control target key start
LH: loop header
LB: loop body
LE: loop exit
PB: predicated region body
PF: predicated region fallthrough
CT: control target
= control target key end

     0   :  { %v294_v54 = vlaneseq  ;;  %v1095_v55 = vmov 0.0   ;;  %vm1097_vm15 = vmmov 0   ;;  %s1392_s1 = inlined_call_operand.vmem [shape: f32[3,128,128], index: 1, kind: input, shape index: {}]   ;;  %s1393_s0 = inlined_call_operand.vmem [shape: f32[18,128], index: 0, kind: input, shape index: {}]   ;;  %s1394_s2 = inlined_call_operand.vmem [shape: f32[16,128], index: 2, kind: output, shape index: {}]  }
   0x1   :  { %v762_v0 = vld [vmem:[%s1392_s1 + $0xf8] sm:$0xff]  ;;  %v761_v2 = vld [vmem:[%s1392_s1 + $0xf0] sm:$0xff]  ;;  %v760_v4 = vld [vmem:[%s1392_s1 + $0xe8] sm:$0xff] }
   0x2   :  { %v28_v1 = vld [vmem:[%s1392_s1 + $0x78] sm:$0xff]  ;;  %915 = vmatprep.subr.mxu0 %v762_v0  ;;  %v27_v3 = vld [vmem:[%s1392_s1 + $0x70] sm:$0xff]  ;;  %v26_v5 = vld [vmem:[%s1392_s1 + $0x68] sm:$0xff]  ;;  %v1283_v56 = vshrl.u32 %v294_v54, 7  ;;  %v312_v57 = vand.u32 127, %v294_v54 }
   0x3   :  { %950 = vmatprep.subr.mxu1 %v28_v1  ;;  %916 = vmatpush3.msra.mxu0 %v762_v0  ;;  %v759_v6 = vld [vmem:[%s1392_s1 + $0xe0] sm:$0xff]  ;;  %v758_v8 = vld [vmem:[%s1392_s1 + $0xd8] sm:$0xff]  ;;  %v757_v10 = vld [vmem:[%s1392_s1 + $0xd0] sm:$0xff] }
   0x4   :  { %951 = vmatpush3.msra.mxu1 %v28_v1  ;;  %917 = vmatprep.subr.mxu0 %v761_v2  ;;  %v25_v7 = vld [vmem:[%s1392_s1 + $0x60] sm:$0xff]  ;;  %v24_v9 = vld [vmem:[%s1392_s1 + $0x58] sm:$0xff]  ;;  %v23_v11 = vld [vmem:[%s1392_s1 + $0x50] sm:$0xff]  ;;  %v310_v58 = vadd.s32 120, %v1283_v56  ;;  %v1286_v59 = vand.u32 3, %v312_v57  ;;  %v309_v60 = vadd.s32 112, %v1283_v56 }
   0x5   :  { %952 = vmatprep.subr.mxu1 %v27_v3  ;;  %918 = vmatpush3.msra.mxu0 %v761_v2  ;;  %v756_v12 = vld [vmem:[%s1392_s1 + $0xc8] sm:$0xff]  ;;  %v755_v14 = vld [vmem:[%s1392_s1 + $0xc0] sm:$0xff]  ;;  %v754_v16 = vld [vmem:[%s1392_s1 + $0xb8] sm:$0xff]  ;;  %v308_v61 = vadd.s32 104, %v1283_v56  ;;  %v307_v62 = vadd.s32 96, %v1283_v56  ;;  %v306_v2 = vadd.s32 88, %v1283_v56 }
   0x6   :  { %953 = vmatpush3.msra.mxu1 %v27_v3  ;;  %919 = vmatprep.subr.mxu0 %v760_v4  ;;  %v22_v13 = vld [vmem:[%s1392_s1 + $0x48] sm:$0xff]  ;;  %v21_v15 = vld [vmem:[%s1392_s1 + $0x40] sm:$0xff]  ;;  %v20_v17 = vld [vmem:[%s1392_s1 + $0x38] sm:$0xff]  ;;  %v422_v63 = vand.u32 3, %v310_v58  ;;  %v415_v0 = vand.u32 3, %v309_v60 }
   0x7   :  { %954 = vmatprep.subr.mxu1 %v26_v5  ;;  %920 = vmatpush3.msra.mxu0 %v760_v4  ;;  %v753_v18 = vld [vmem:[%s1392_s1 + $0xb0] sm:$0xff]  ;;  %v752_v20 = vld [vmem:[%s1392_s1 + $0xa8] sm:$0xff]  ;;  %v751_v22 = vld [vmem:[%s1392_s1 + $0xa0] sm:$0xff]  ;;  %v408_v1 = vand.u32 3, %v308_v61  ;;  %v401_v3 = vand.u32 3, %v307_v62  ;;  %v305_v4 = vadd.s32 80, %v1283_v56 }
   0x8   :  { %955 = vmatpush3.msra.mxu1 %v26_v5  ;;  %921 = vmatprep.subr.mxu0 %v759_v6  ;;  %v19_v19 = vld [vmem:[%s1392_s1 + $0x30] sm:$0xff]  ;;  %v18_v21 = vld [vmem:[%s1392_s1 + $0x28] sm:$0xff]  ;;  %v17_v23 = vld [vmem:[%s1392_s1 + $0x20] sm:$0xff]  ;;  %vm532_vm0 = vcmp.eq.s32.totalorder %v422_v63, %v1286_v59  ;;  %vm531_vm1 = vcmp.eq.s32.totalorder %v415_v0, %v1286_v59  ;;  %v1096_v5 = vmov 1.0  }
   0x9   :  { %956 = vmatprep.subr.mxu1 %v25_v7  ;;  %922 = vmatpush3.msra.mxu0 %v759_v6  ;;  %v750_v24 = vld [vmem:[%s1392_s1 + $0x98] sm:$0xff]  ;;  %v749_v26 = vld [vmem:[%s1392_s1 + $0x90] sm:$0xff]  ;;  %v748_v28 = vld [vmem:[%s1392_s1 + $0x88] sm:$0xff]  ;;  %vm530_vm2 = vcmp.eq.s32.totalorder %v408_v1, %v1286_v59  ;;  %v394_v6 = vand.u32 3, %v306_v2  ;;  %vm529_vm3 = vcmp.eq.s32.totalorder %v401_v3, %v1286_v59 }
   0xa   :  { %957 = vmatpush3.msra.mxu1 %v25_v7  ;;  %923 = vmatprep.subr.mxu0 %v758_v8  ;;  %v16_v25 = vld [vmem:[%s1392_s1 + $0x18] sm:$0xff]  ;;  %v15_v27 = vld [vmem:[%s1392_s1 + $0x10] sm:$0xff]  ;;  %v14_v29 = vld [vmem:[%s1392_s1 + $0x8] sm:$0xff]  ;;  %v387_v7 = vand.u32 3, %v305_v4 }
   0xb   :  { %958 = vmatprep.subr.mxu1 %v24_v9  ;;  %924 = vmatpush3.msra.mxu0 %v758_v8  ;;  %v747_v30 = vld [vmem:[%s1392_s1 + $0x80] sm:$0xff]  ;;  %v1220_v34 = vld [vmem:[%s1393_s0 + $0x9] sm:$0xff]  ;;  %v778_v36 = vld [vmem:[%s1392_s1 + $0x178] sm:$0xff]  ;;  %vm528_vm4 = vcmp.eq.s32.totalorder %v394_v6, %v1286_v59  ;;  %v304_v8 = vadd.s32 72, %v1283_v56 }
   0xc   :  { %959 = vmatpush3.msra.mxu1 %v24_v9  ;;  %925 = vmatprep.subr.mxu0 %v757_v10  ;;  %v13_v31 = vld [vmem:[%s1392_s1] sm:$0xff]  ;;  %v12_v35 = vld [vmem:[%s1393_s0 + $0x8] sm:$0xff]  ;;  %v777_v38 = vld [vmem:[%s1392_s1 + $0x170] sm:$0xff]  ;;  %vm527_vm5 = vcmp.eq.s32.totalorder %v387_v7, %v1286_v59 }
   0xd   :  { %960 = vmatprep.subr.mxu1 %v23_v11  ;;  %926 = vmatpush3.msra.mxu0 %v757_v10  ;;  %v1212_v32 = vld [vmem:[%s1393_s0 + $0x1] sm:$0xff]  ;;  %v774_v41 = vld [vmem:[%s1392_s1 + $0x158] sm:$0xff]  ;;  %v773_v42 = vld [vmem:[%s1392_s1 + $0x150] sm:$0xff]  ;;  %v380_v9 = vand.u32 3, %v304_v8  ;;  %v303_v10 = vadd.s32 64, %v1283_v56 }
   0xe   :  { %961 = vmatpush3.msra.mxu1 %v23_v11  ;;  %927 = vmatprep.subr.mxu0 %v756_v12  ;;  %v11_v33 = vld [vmem:[%s1393_s0] sm:$0xff]  ;;  %v776_v39 = vld [vmem:[%s1392_s1 + $0x168] sm:$0xff]  ;;  %v770_v45 = vld [vmem:[%s1392_s1 + $0x138] sm:$0xff] }
   0xf   :  { %962 = vmatprep.subr.mxu1 %v22_v13  ;;  %928 = vmatpush3.msra.mxu0 %v756_v12  ;;  %v198_v37 = vld [vmem:[%s1393_s0 + $0x2] sm:$0xff]  ;;  %v769_v46 = vld [vmem:[%s1392_s1 + $0x130] sm:$0xff]  ;;  %v766_v49 = vld [vmem:[%s1392_s1 + $0x118] sm:$0xff]  ;;  %vm526_vm6 = vcmp.eq.s32.totalorder %v380_v9, %v1286_v59  ;;  %v373_v11 = vand.u32 3, %v303_v10  ;;  %v302_v12 = vadd.s32 56, %v1283_v56 }
  0x10   :  { %963 = vmatpush3.msra.mxu1 %v22_v13  ;;  %929 = vmatprep.subr.mxu0 %v755_v14  ;;  %v775_v40 = vld [vmem:[%s1392_s1 + $0x160] sm:$0xff]  ;;  %v772_v43 = vld [vmem:[%s1392_s1 + $0x148] sm:$0xff]  ;;  %v765_v50 = vld [vmem:[%s1392_s1 + $0x110] sm:$0xff] }
  0x11   :  { %964 = vmatprep.subr.mxu1 %v21_v15  ;;  %930 = vmatpush3.msra.mxu0 %v755_v14  ;;  %v771_v44 = vld [vmem:[%s1392_s1 + $0x140] sm:$0xff]  ;;  %v768_v47 = vld [vmem:[%s1392_s1 + $0x128] sm:$0xff]  ;;  %vm525_vm7 = vcmp.eq.s32.totalorder %v373_v11, %v1286_v59  ;;  %v366_v13 = vand.u32 3, %v302_v12  ;;  %v301_v14 = vadd.s32 48, %v1283_v56 }
  0x12   :  { %965 = vmatpush3.msra.mxu1 %v21_v15  ;;  %931 = vmatprep.subr.mxu0 %v754_v16  ;;  %v767_v48 = vld [vmem:[%s1392_s1 + $0x120] sm:$0xff]  ;;  %v764_v51 = vld [vmem:[%s1392_s1 + $0x108] sm:$0xff] }
  0x13   :  { %966 = vmatprep.subr.mxu1 %v20_v17  ;;  %932 = vmatpush3.msra.mxu0 %v754_v16  ;;  %v763_v52 = vld [vmem:[%s1392_s1 + $0x100] sm:$0xff]  ;;  %v199_v53 = vld [vmem:[%s1393_s0 + $0xa] sm:$0xff]  ;;  %vm524_vm8 = vcmp.eq.s32.totalorder %v366_v13, %v1286_v59  ;;  %v359_v15 = vand.u32 3, %v301_v14  ;;  %v300_v16 = vadd.s32 40, %v1283_v56 }
  0x14   :  { %967 = vmatpush3.msra.mxu1 %v20_v17  ;;  %933 = vmatprep.subr.mxu0 %v753_v18 }
  0x15   :  { %968 = vmatprep.subr.mxu1 %v19_v19  ;;  %934 = vmatpush3.msra.mxu0 %v753_v18  ;;  %vm523_vm9 = vcmp.eq.s32.totalorder %v359_v15, %v1286_v59  ;;  %v352_v17 = vand.u32 3, %v300_v16  ;;  %v299_v18 = vadd.s32 32, %v1283_v56 }
  0x16   :  { %969 = vmatpush3.msra.mxu1 %v19_v19  ;;  %935 = vmatprep.subr.mxu0 %v752_v20 }
  0x17   :  { %970 = vmatprep.subr.mxu1 %v18_v21  ;;  %936 = vmatpush3.msra.mxu0 %v752_v20  ;;  %vm522_vm10 = vcmp.eq.s32.totalorder %v352_v17, %v1286_v59  ;;  %v345_v19 = vand.u32 3, %v299_v18  ;;  %v298_v20 = vadd.s32 24, %v1283_v56 }
  0x18   :  { %971 = vmatpush3.msra.mxu1 %v18_v21  ;;  %937 = vmatprep.subr.mxu0 %v751_v22 }
  0x19   :  { %972 = vmatprep.subr.mxu1 %v17_v23  ;;  %938 = vmatpush3.msra.mxu0 %v751_v22  ;;  %vm521_vm11 = vcmp.eq.s32.totalorder %v345_v19, %v1286_v59  ;;  %v338_v21 = vand.u32 3, %v298_v20  ;;  %v297_v22 = vadd.s32 16, %v1283_v56 }
  0x1a   :  { %973 = vmatpush3.msra.mxu1 %v17_v23  ;;  %939 = vmatprep.subr.mxu0 %v750_v24 }
  0x1b   :  { %974 = vmatprep.subr.mxu1 %v16_v25  ;;  %940 = vmatpush3.msra.mxu0 %v750_v24  ;;  %vm520_vm12 = vcmp.eq.s32.totalorder %v338_v21, %v1286_v59  ;;  %v331_v23 = vand.u32 3, %v297_v22  ;;  %v296_v24 = vadd.s32 8, %v1283_v56 }
  0x1c   :  { %975 = vmatpush3.msra.mxu1 %v16_v25  ;;  %941 = vmatprep.subr.mxu0 %v749_v26 }
  0x1d   :  { %976 = vmatprep.subr.mxu1 %v15_v27  ;;  %942 = vmatpush3.msra.mxu0 %v749_v26  ;;  %vm519_vm13 = vcmp.eq.s32.totalorder %v331_v23, %v1286_v59  ;;  %v324_v25 = vand.u32 3, %v296_v24  ;;  %v317_v26 = vand.u32 3, %v1283_v56 }
  0x1e   :  { %977 = vmatpush3.msra.mxu1 %v15_v27  ;;  %943 = vmatprep.subr.mxu0 %v748_v28 }
  0x1f   :  { %978 = vmatprep.subr.mxu1 %v14_v29  ;;  %944 = vmatpush3.msra.mxu0 %v748_v28  ;;  %vm518_vm14 = vcmp.eq.s32.totalorder %v324_v25, %v1286_v59 }
  0x20   :  { %979 = vmatpush3.msra.mxu1 %v14_v29  ;;  %945 = vmatprep.subr.mxu0 %v747_v30 }
  0x21   :  { %980 = vmatprep.subr.mxu1 %v13_v31  ;;  %946 = vmatpush3.msra.mxu0 %v747_v30 }
  0x22   :  { %947 = vmatprep.mubr.f32.mxu0 %v1212_v32  ;;  %981 = vmatpush3.msra.mxu1 %v13_v31 }
  0x23   :  { %982 = vmatprep.mubr.f32.mxu1 %v11_v33  ;;  %948 = vmatmul.mubr.f32.vlgmr.msra.gmra.mxu0 %v1220_v34 }
  0x24   :  { %983 = vmatmul.mubr.f32.vlgmr.msra.gmra.mxu1 %v12_v35  ;;  %985 = vmatprep.subr.mxu0 %v778_v36 }
  0x25   :  { %1017 = vmatprep.mubr.f32.mxu0 %v198_v37  ;;  %986 = vmatpush3.msra.mxu0 %v778_v36 }
  0x26   :  { %987 = vmatprep.subr.mxu0 %v777_v38  ;;  %1020 = vmatprep.subr.mxu1 %v1095_v55 }
  0x27   :  { %988 = vmatpush3.msra.mxu0 %v777_v38  ;;  %1021 = vmatpush3.msk.msra.mxu1 %vm532_vm0, %v1096_v5 }
  0x28   :  { %989 = vmatprep.subr.mxu0 %v776_v39  ;;  %1022 = vmatprep.subr.mxu1 %v1095_v55 }
  0x29   :  { %990 = vmatpush3.msra.mxu0 %v776_v39  ;;  %1023 = vmatpush3.msk.msra.mxu1 %vm531_vm1, %v1096_v5 }
  0x2a   :  { %991 = vmatprep.subr.mxu0 %v775_v40  ;;  %1024 = vmatprep.subr.mxu1 %v1095_v55 }
  0x2b   :  { %992 = vmatpush3.msra.mxu0 %v775_v40  ;;  %1025 = vmatpush3.msk.msra.mxu1 %vm530_vm2, %v1096_v5 }
  0x2c   :  { %993 = vmatprep.subr.mxu0 %v774_v41  ;;  %1026 = vmatprep.subr.mxu1 %v1095_v55 }
  0x2d   :  { %994 = vmatpush3.msra.mxu0 %v774_v41  ;;  %1027 = vmatpush3.msk.msra.mxu1 %vm529_vm3, %v1096_v5 }
  0x2e   :  { %995 = vmatprep.subr.mxu0 %v773_v42  ;;  %1028 = vmatprep.subr.mxu1 %v1095_v55 }
  0x2f   :  { %996 = vmatpush3.msra.mxu0 %v773_v42  ;;  %1029 = vmatpush3.msk.msra.mxu1 %vm528_vm4, %v1096_v5 }
  0x30   :  { %997 = vmatprep.subr.mxu0 %v772_v43  ;;  %1030 = vmatprep.subr.mxu1 %v1095_v55 }
  0x31   :  { %998 = vmatpush3.msra.mxu0 %v772_v43  ;;  %1031 = vmatpush3.msk.msra.mxu1 %vm527_vm5, %v1096_v5 }
  0x32   :  { %999 = vmatprep.subr.mxu0 %v771_v44  ;;  %1032 = vmatprep.subr.mxu1 %v1095_v55 }
  0x33   :  { %1000 = vmatpush3.msra.mxu0 %v771_v44  ;;  %1033 = vmatpush3.msk.msra.mxu1 %vm526_vm6, %v1096_v5 }
  0x34   :  { %1001 = vmatprep.subr.mxu0 %v770_v45  ;;  %1034 = vmatprep.subr.mxu1 %v1095_v55 }
  0x35   :  { %1002 = vmatpush3.msra.mxu0 %v770_v45  ;;  %1035 = vmatpush3.msk.msra.mxu1 %vm525_vm7, %v1096_v5 }
  0x36   :  { %1003 = vmatprep.subr.mxu0 %v769_v46  ;;  %1036 = vmatprep.subr.mxu1 %v1095_v55 }
  0x37   :  { %1004 = vmatpush3.msra.mxu0 %v769_v46  ;;  %1037 = vmatpush3.msk.msra.mxu1 %vm524_vm8, %v1096_v5  ;;  %v645_v46 = vsub.s32 0, %v1283_v56 }
  0x38   :  { %1005 = vmatprep.subr.mxu0 %v768_v47  ;;  %1038 = vmatprep.subr.mxu1 %v1095_v55 }
  0x39   :  { %1006 = vmatpush3.msra.mxu0 %v768_v47  ;;  %1039 = vmatpush3.msk.msra.mxu1 %vm523_vm9, %v1096_v5 }
  0x3a   :  { %1007 = vmatprep.subr.mxu0 %v767_v48  ;;  %1040 = vmatprep.subr.mxu1 %v1095_v55 }
  0x3b   :  { %1008 = vmatpush3.msra.mxu0 %v767_v48  ;;  %1041 = vmatpush3.msk.msra.mxu1 %vm522_vm10, %v1096_v5 }
  0x3c   :  { %1009 = vmatprep.subr.mxu0 %v766_v49  ;;  %1042 = vmatprep.subr.mxu1 %v1095_v55 }
  0x3d   :  { %1010 = vmatpush3.msra.mxu0 %v766_v49  ;;  %1043 = vmatpush3.msk.msra.mxu1 %vm521_vm11, %v1096_v5 }
  0x3e   :  { %1011 = vmatprep.subr.mxu0 %v765_v50  ;;  %1044 = vmatprep.subr.mxu1 %v1095_v55 }
  0x3f   :  { %1012 = vmatpush3.msra.mxu0 %v765_v50  ;;  %1045 = vmatpush3.msk.msra.mxu1 %vm520_vm12, %v1096_v5 }
  0x40   :  { %1013 = vmatprep.subr.mxu0 %v764_v51  ;;  %1046 = vmatprep.subr.mxu1 %v1095_v55 }
  0x41   :  { %1014 = vmatpush3.msra.mxu0 %v764_v51  ;;  %1047 = vmatpush3.msk.msra.mxu1 %vm519_vm13, %v1096_v5 }
  0x42   :  { %1015 = vmatprep.subr.mxu0 %v763_v52  ;;  %1048 = vmatprep.subr.mxu1 %v1095_v55 }
  0x43   :  { %1016 = vmatpush3.msra.mxu0 %v763_v52  ;;  %1049 = vmatpush3.msk.msra.mxu1 %vm518_vm14, %v1096_v5 }
  0x44   :  { %1018 = vmatmul.mubr.f32.vlgmr.msra.gmra.mxu0 %v199_v53  ;;  %1055 = vmatprep.subr.mxu0 %v1095_v55 }
  0x45   :  { %1056 = vmatpush3.msk.msra.mxu0 %vm532_vm0, %v1096_v5  ;;  %1052 = vmatprep.mubr.msk.f32.mxu1 %vm1097_vm15, %v1095_v55  ;;  %vm517_vm0 = vcmp.eq.s32.totalorder %v317_v26, %v1286_v59 }
  0x46   :  { %1057 = vmatprep.subr.mxu0 %v1095_v55  ;;  %1050 = vmatprep.subr.mxu1 %v1095_v55 }
  0x47   :  { %1058 = vmatpush3.msk.msra.mxu0 %vm531_vm1, %v1096_v5  ;;  %1051 = vmatpush3.msk.msra.mxu1 %vm517_vm0, %v1096_v5 }
  0x48   :  { %1059 = vmatprep.subr.mxu0 %v1095_v55  ;;  %1087 = vmatprep.mubr.msk.f32.mxu0 %vm1097_vm15, %v1095_v55 }
  0x49   :  { %1060 = vmatpush3.msk.msra.mxu0 %vm530_vm2, %v1096_v5 }
  0x4a   :  { %1061 = vmatprep.subr.mxu0 %v1095_v55 }
  0x4b   :  { %1062 = vmatpush3.msk.msra.mxu0 %vm529_vm3, %v1096_v5 }
  0x4c   :  { %1063 = vmatprep.subr.mxu0 %v1095_v55 }
  0x4d   :  { %1064 = vmatpush3.msk.msra.mxu0 %vm528_vm4, %v1096_v5 }
  0x4e   :  { %1065 = vmatprep.subr.mxu0 %v1095_v55 }
  0x4f   :  { %1066 = vmatpush3.msk.msra.mxu0 %vm527_vm5, %v1096_v5 }
  0x50   :  { %1067 = vmatprep.subr.mxu0 %v1095_v55 }
  0x51   :  { %1068 = vmatpush3.msk.msra.mxu0 %vm526_vm6, %v1096_v5 }
  0x52   :  { %1069 = vmatprep.subr.mxu0 %v1095_v55 }
  0x53   :  { %1070 = vmatpush3.msk.msra.mxu0 %vm525_vm7, %v1096_v5 }
  0x54   :  { %1071 = vmatprep.subr.mxu0 %v1095_v55 }
  0x55   :  { %1072 = vmatpush3.msk.msra.mxu0 %vm524_vm8, %v1096_v5 }
  0x56   :  { %1073 = vmatprep.subr.mxu0 %v1095_v55 }
  0x57   :  { %1074 = vmatpush3.msk.msra.mxu0 %vm523_vm9, %v1096_v5 }
  0x58   :  { %1075 = vmatprep.subr.mxu0 %v1095_v55 }
  0x59   :  { %1076 = vmatpush3.msk.msra.mxu0 %vm522_vm10, %v1096_v5 }
  0x5a   :  { %1077 = vmatprep.subr.mxu0 %v1095_v55 }
  0x5b   :  { %1078 = vmatpush3.msk.msra.mxu0 %vm521_vm11, %v1096_v5 }
  0x5c   :  { %1079 = vmatprep.subr.mxu0 %v1095_v55 }
  0x5d   :  { %1080 = vmatpush3.msk.msra.mxu0 %vm520_vm12, %v1096_v5 }
  0x5e   :  { %1081 = vmatprep.subr.mxu0 %v1095_v55 }
  0x5f   :  { %1082 = vmatpush3.msk.msra.mxu0 %vm519_vm13, %v1096_v5 }
  0x60   :  { %1083 = vmatprep.subr.mxu0 %v1095_v55 }
  0x61   :  { %1084 = vmatpush3.msk.msra.mxu0 %vm518_vm14, %v1096_v5 }
  0x62   :  { %1085 = vmatprep.subr.mxu0 %v1095_v55 }
  0x63   :  { %1086 = vmatpush3.msk.msra.mxu0 %vm517_vm0, %v1096_v5 }
  0xe3   :  { %v949_v27 = vpop.f32.mrf.mxu0 }
  0xe4   :  { %v984_v28 = vpop.f32.mrf.mxu1 }
  0xe5   :  { %v114_v29 = vpop.f32.mrf.mxu0  ;;  %v195_v33 = vadd.f32 %v984_v28, %v949_v27 }
  0xe6   :  { %v189_v30 = vpop.f32.mrf.mxu1 }
  0xe7   :  { %v190_v35 = vadd.f32 %v189_v30, %v114_v29 }
 0x104   :  { %v1019_v31 = vpop.f32.mrf.mxu0 }
 0x105   :  { %v293_v37 = vadd.f32 %v1019_v31, %v195_v33 }
 0x106   :  { %v283_v36 = vpop.f32.mrf.mxu0 }
 0x107   :  { %v292_v38 = vadd.f32 %v283_v36, %v190_v35 }
 0x109   :  { %v565_v39 = vadd.f32 %v293_v37, %v292_v38 }
 0x10b   :  { %v566_v40 = vrot.slane %v565_v39, 4 }
 0x10d   :  { %v567_v41 = vadd.f32 %v566_v40, %v565_v39 }
 0x10f   :  { %v568_v42 = vrot.slane %v567_v41, 2 }
 0x111   :  { %v569_v43 = vadd.f32 %v568_v42, %v567_v41 }
 0x113   :  { %v570_v44 = vrot.slane %v569_v43, 1 }
 0x115   :  { %v571_v45 = vadd.f32 %v570_v44, %v569_v43 }
 0x117   :  { %1053 = vmatmul.mubr.f32.vlgmr.msra.gmra.mxu1 %v571_v45 }
 0x1d7   :  { %v638_v47 = vpop.f32.mrf.mxu1 }
 0x1d8   :  { %v642_v48 = vmul.f32 0.001953125, %v638_v47 }
 0x1d9   :  { %v1054_v49 = vpop.f32.mrf.mxu1 }
 0x1da   :  { %v646_v50 = vrot.slane %v642_v48, %v645_v46 }
 0x1dc   :  { %v647_v51 = vsub.f32 %v292_v38, %v646_v50  ;;  %v648_v52 = vsub.f32 %v293_v37, %v646_v50 }
 0x1de   :  { %v649_v53 = vmul.f32 %v647_v51, %v647_v51  ;;  %v650_v54 = vmul.f32 %v648_v52, %v648_v52 }
 0x1e0   :  { %v651_v55 = vadd.f32 %v650_v54, %v649_v53 }
 0x1e2   :  { %v652_v57 = vrot.slane %v651_v55, 4 }
 0x1e4   :  { %v653_v58 = vadd.f32 %v652_v57, %v651_v55 }
 0x1e6   :  { %v654_v59 = vrot.slane %v653_v58, 2 }
 0x1e8   :  { %v655_v60 = vadd.f32 %v654_v59, %v653_v58 }
 0x1ea   :  { %v656_v61 = vrot.slane %v655_v60, 1 }
 0x1ec   :  { %v657_v62 = vadd.f32 %v656_v61, %v655_v60 }
 0x1ee   :  { %1088 = vmatmul.mubr.f32.vlgmr.msra.gmra.mxu0 %v657_v62 }
 0x2ae   :  { %v724_v63 = vpop.f32.mrf.mxu0 }
 0x2af   :  { %v728_v0 = vmul.f32 0.001953125, %v724_v63 }
 0x2b0   :  { %v1089_v1 = vpop.f32.mrf.mxu0 }
 0x2b1   :  { %v729_v56 = vadd.f32 1e-05, %v728_v0 }
 0x2b3   :  { %1093 = vrsqrt.f32 %v729_v56 }
 0x2c0   :  { %v1094_v2 = vpop.eup %1093 }
 0x2c1   :  { %v734_v3 = vrot.slane %v1094_v2, %v645_v46 }
 0x2c3   :  { %v735_v4 = vmul.f32 %v734_v3, %v647_v51  ;;  %v736_v5 = vmul.f32 %v734_v3, %v648_v52 }
 0x2c5   :  { %v737_v6 = vmax.f32 %v735_v4, 0.0  ;;  %v738_v7 = vmax.f32 %v736_v5, 0.0 }
 0x2c7   :  { %v739_v8 = vadd.f32 %v737_v6, %v1212_v32  ;;  %v740_v9 = vadd.f32 %v738_v7, %v1220_v34 }
 0x2c9   :  { %741 = vst [vmem:[%s1394_s2] sm:$0xff] %v739_v8  ;;  %742 = vst [vmem:[%s1394_s2 + $0x8] sm:$0xff] %v740_v9 }

</bundles_post_ra>
